<compile_context>
chip_gen: v7x
topology: tpu7x:2x2x1
jax: 0.10.0
libtpu: 0.0.40
codegen_flags: <defaults>
</compile_context>

<pallas_src>
import math

import jax
import jax.numpy as jnp
from jax.experimental import pallas as pl
from jax.experimental.pallas import tpu as pltpu


_LANE = 128
_SUBLANE = 8
_MAX_LANES = 1024
_MIN_TOTAL_STEPS = 4                      # >= 2 steps per v7x TensorCore
_MIN_BYTES_FOR_SPLIT = 2 * 1024 * 1024    # only force-split decently sized inputs
_SCALE_TILE_BYTES = 4096                  # VMEM cost of one (1, 1) scale tile


def _droppath_kernel(x_ref, s_ref, o_ref):
    # x_ref/o_ref: data block; s_ref: per-sample scale (0.0 or 1/keep_prob),
    # already in the input dtype.  Single broadcasted multiply (HBM-bound).
    o_ref[...] = (x_ref[...] * s_ref[...]).astype(o_ref.dtype)


def _round_up(a: int, m: int) -> int:
    return ((a + m - 1) // m) * m


def _vmem_budget():
    """(target block bytes, scoped-VMEM limit) tuned per TPU generation."""
    try:
        vmem = int(pltpu.get_tpu_info().vmem_capacity_bytes)
    except Exception:
        vmem = 0
    if vmem >= 96 * 1024 * 1024:                 # v5e / v6e: 128 MiB VMEM
        return 8 * 1024 * 1024, 64 * 1024 * 1024
    # v7x (64 MiB / TensorCore) or unknown: smaller tiles, modest limit.
    return 4 * 1024 * 1024, 48 * 1024 * 1024


def _choose_lane_width(feat: int) -> int:
    """Largest multiple of 128 dividing feat (<= _MAX_LANES) that still leaves
    >= 8 sublane rows per sample; otherwise the narrowest candidate (better
    sublane occupancy for tiny features)."""
    candidates = [m * _LANE for m in range(1, _MAX_LANES // _LANE + 1)
                  if feat % (m * _LANE) == 0]
    good = [lw for lw in candidates if feat // lw >= _SUBLANE]
    return max(good) if good else min(candidates)


def _cap_for_steps(extent: int, block: int, align: int, want_steps: int) -> int:
    """Shrink `block` so this dim yields >= want_steps (preferably even) grid
    steps, provided the extent can still be covered by align-sized blocks."""
    if extent < want_steps * align:
        return block
    steps = max(want_steps, pl.cdiv(extent, block))
    if steps % 2:
        steps += 1
    return min(block, max(align, _round_up(pl.cdiv(extent, steps), align)))


def _size_blocks(n, n_align, inner, inner_align, inner_unit_bytes,
                 per_sample_extra_bytes, total_bytes, target_bytes):
    """Pick (sample block, inner block) close to target_bytes, then make sure
    large inputs produce >= _MIN_TOTAL_STEPS (even) grid steps."""
    # Inner (minor / contiguous) dimension first.
    inner_budget = max(1, target_bytes // inner_unit_bytes)
    if inner_budget >= inner or inner <= inner_align:
        bi = inner                                           # full dim: always legal
    else:
        bi = max(inner_align, inner_budget // inner_align * inner_align)

    # Then the sample dimension (account for the per-sample scale tile too).
    per_sample = bi * inner_unit_bytes + per_sample_extra_bytes
    n_budget = max(1, target_bytes // per_sample)
    if n_budget >= n or n <= n_align:
        bn = n
    else:
        bn = max(n_align, n_budget // n_align * n_align)

    # >= 4 (even) total steps for inputs big enough to pipeline / feed both
    # v7x TensorCores; no-op for small inputs.
    if total_bytes >= _MIN_BYTES_FOR_SPLIT:
        n_steps, i_steps = pl.cdiv(n, bn), pl.cdiv(inner, bi)
        if n_steps * i_steps < _MIN_TOTAL_STEPS or (n_steps * i_steps) % 2:
            want_i = max(2, -(-_MIN_TOTAL_STEPS // n_steps))
            bi = _cap_for_steps(inner, bi, inner_align, want_i)
            i_steps = pl.cdiv(inner, bi)
        if n_steps * i_steps < _MIN_TOTAL_STEPS or (n_steps * i_steps) % 2:
            want_n = max(2, -(-_MIN_TOTAL_STEPS // i_steps))
            bn = _cap_for_steps(n, bn, n_align, want_n)
    return bn, bi


def drop_path(x: jax.Array, p: float, key: jax.Array,
              training: bool = True) -> jax.Array:
    """DropPath / stochastic-depth forward.  x is (N, ...) (e.g. NCHW)."""
    if p == 0.0 or not training:
        return x
    if not (0.0 < p < 1.0):
        raise ValueError(f"drop_path probability must be in [0, 1), got {p}")

    kp = 1.0 - p
    n = x.shape[0]
    feat = math.prod(x.shape[1:]) if x.ndim > 1 else 1
    dtype = x.dtype
    itemsize = jnp.dtype(dtype).itemsize

    # Per-sample scale computed once in float32 (avoids the bf16 rounding
    # hazard where kp + r rounds up to 1.0 and flips the mask), then cast to
    # the input dtype so the kernel multiplies without upcasting x.
    rand = jax.random.uniform(key, (n, 1), dtype=jnp.float32)
    scale = jnp.floor(kp + rand) * (1.0 / kp)            # (n, 1): 0.0 or 1/kp
    s_dtype = dtype if jnp.issubdtype(dtype, jnp.floating) else jnp.float32
    scale = scale.astype(s_dtype)

    target_bytes, vmem_limit = _vmem_budget()
    total_bytes = n * feat * itemsize
    cost = pl.CostEstimate(
        flops=n * feat, transcendentals=0,
        bytes_accessed=2 * total_bytes + n * jnp.dtype(s_dtype).itemsize)
    cparams = pltpu.CompilerParams(
        dimension_semantics=("parallel", "parallel"),
        vmem_limit_bytes=vmem_limit)

    if feat % _LANE == 0:
        # Lane-dense path: (N, rows, lane_w) view; pure reshape, no padding.
        lane_w = _choose_lane_width(feat)
        rows = feat // lane_w
        x_v = x.reshape(n, rows, lane_w)
        s_v = scale.reshape(n, 1, 1)
        bn, br = _size_blocks(n, 1, rows, _SUBLANE, lane_w * itemsize,
                              _SCALE_TILE_BYTES, total_bytes, target_bytes)
        grid = (pl.cdiv(n, bn), pl.cdiv(rows, br))
        x_spec = pl.BlockSpec((bn, br, lane_w), lambda i, j: (i, j, 0))
        s_spec = pl.BlockSpec((bn, 1, 1), lambda i, j: (i, 0, 0))
        o_spec = pl.BlockSpec((bn, br, lane_w), lambda i, j: (i, j, 0))
        out_shape = jax.ShapeDtypeStruct((n, rows, lane_w), dtype)
    else:
        # Ragged-feature path: tile the raw (N, feat) view with
        # multiple-of-128 feature blocks; Pallas masks the edge block, so no
        # wrapper-side pad or output slice (no extra HBM passes).
        x_v = x.reshape(n, feat)
        s_v = scale                                        # (n, 1)
        bn, bf = _size_blocks(n, _SUBLANE, feat, _LANE, itemsize,
                              512, total_bytes, target_bytes)
        grid = (pl.cdiv(n, bn), pl.cdiv(feat, bf))
        x_spec = pl.BlockSpec((bn, bf), lambda i, j: (i, j))
        s_spec = pl.BlockSpec((bn, 1), lambda i, j: (i, 0))
        o_spec = pl.BlockSpec((bn, bf), lambda i, j: (i, j))
        out_shape = jax.ShapeDtypeStruct((n, feat), dtype)

    # TODO(synk): optionally skip the HBM read of x for dropped samples
    # (scalar-prefetched keep mask + manual DMA under pl.when) to save ~p/2 of
    # the traffic; omitted to keep the auto-pipelined kernel simple.

    out = pl.pallas_call(
        _droppath_kernel,
        out_shape=out_shape,
        grid=grid,
        in_specs=[x_spec, s_spec],
        out_specs=o_spec,
        compiler_params=cparams,
        cost_estimate=cost,
    )(x_v, s_v)
    return out.reshape(x.shape)


if __name__ == "__main__":
    root = jax.random.PRNGKey(0)
    kx, kmask, kx2, kmask2, kx3, kmask3 = jax.random.split(root, 6)

    p = 0.3
    kp = 1.0 - p

    # 1) Small NCHW input, feature size multiple of 128 (lane-dense path).
    x = jax.random.normal(kx, (2, 4, 16, 16), dtype=jnp.float32)
    out = jax.block_until_ready(drop_path(x, p, kmask, training=True))
    rand = jax.random.uniform(kmask, (2, 1), dtype=jnp.float32)
    mask = jnp.floor(kp + rand).reshape(2, 1, 1, 1)
    ref = x / kp * mask
    assert jnp.allclose(out, ref, rtol=1e-5, atol=1e-6), "f32 mismatch"

    # 2) Feature size NOT a multiple of 128 (ragged path: no pad / no slice).
    x2 = jax.random.normal(kx2, (4, 3, 5, 5), dtype=jnp.float32)
    out2 = jax.block_until_ready(drop_path(x2, p, kmask2, training=True))
    rand2 = jax.random.uniform(kmask2, (4, 1), dtype=jnp.float32)
    mask2 = jnp.floor(kp + rand2).reshape(4, 1, 1, 1)
    ref2 = x2 / kp * mask2
    assert jnp.allclose(out2, ref2, rtol=1e-5, atol=1e-6), "ragged mismatch"

    # 3) bf16 input: kernel multiplies in bf16 (no f32 upcast of x).
    x3 = jax.random.normal(kx3, (2, 8, 16, 16), dtype=jnp.bfloat16)
    out3 = jax.block_until_ready(drop_path(x3, p, kmask3, training=True))
    rand3 = jax.random.uniform(kmask3, (2, 1), dtype=jnp.float32)
    mask3 = jnp.floor(kp + rand3).reshape(2, 1, 1, 1)
    ref3 = (x3.astype(jnp.float32) / kp * mask3).astype(jnp.bfloat16)
    assert jnp.allclose(out3.astype(jnp.float32), ref3.astype(jnp.float32),
                        rtol=5e-2, atol=5e-2), "bf16 mismatch"

    # 4) Eval mode and p == 0 are identity.
    assert jnp.allclose(
        jax.block_until_ready(drop_path(x, p, kmask, training=False)), x)
    assert jnp.allclose(
        jax.block_until_ready(drop_path(x, 0.0, kmask, training=True)), x)

    print("KERNEL_OK")
</pallas_src>

<mosaic_0001>
module attributes {stable_mosaic.version = 11 : i64} {
  func.func @_droppath_kernel(%arg0: i32, %arg1: i32, %arg2: memref<2x8x128xf32, #tpu.memory_space<vmem>>, %arg3: memref<2x1x1xf32, #tpu.memory_space<vmem>>, %arg4: memref<2x8x128xf32, #tpu.memory_space<vmem>>) attributes {dimension_semantics = [#tpu.dimension_semantics<parallel>, #tpu.dimension_semantics<parallel>], iteration_bounds = array<i64: 1, 1>, scalar_prefetch = 0 : i64, scratch_operands = 0 : i64, tpu.core_type = #tpu.core_type<tc>, window_params = [{transform_indices = @transform_0, window_bounds = array<i64: 2, 8, 128>}, {transform_indices = @transform_1, window_bounds = array<i64: 2, 1, 1>}, {transform_indices = @transform_2, window_bounds = array<i64: 2, 8, 128>}]} {
    %c0 = arith.constant 0 : index
    %c0_0 = arith.constant 0 : index
    %c0_1 = arith.constant 0 : index
    %0 = vector.load %arg2[%c0, %c0_0, %c0_1] : memref<2x8x128xf32, #tpu.memory_space<vmem>>, vector<2x8x128xf32>
    %c0_2 = arith.constant 0 : index
    %c0_3 = arith.constant 0 : index
    %c0_4 = arith.constant 0 : index
    %1 = vector.load %arg3[%c0_2, %c0_3, %c0_4] : memref<2x1x1xf32, #tpu.memory_space<vmem>>, vector<2x1x1xf32>
    %2 = vector.broadcast %1 : vector<2x1x1xf32> to vector<2x8x128xf32>
    %3 = arith.mulf %0, %2 : vector<2x8x128xf32>
    %c0_5 = arith.constant 0 : index
    %c0_6 = arith.constant 0 : index
    %c0_7 = arith.constant 0 : index
    %4 = vector.load %arg4[%c0_5, %c0_6, %c0_7] : memref<2x8x128xf32, #tpu.memory_space<vmem>>, vector<2x8x128xf32>
    tpu.vector_store %arg4[%c0_5, %c0_6, %c0_7], %3 {strides = array<i32>} : memref<2x8x128xf32, #tpu.memory_space<vmem>>, vector<2x8x128xf32>,
    return
  }
  func.func @transform_0(%arg0: i32, %arg1: i32) -> (i32, i32, i32) {
    %c0_i32 = arith.constant 0 : i32
    %c0_i32_0 = arith.constant 0 : i32
    return %arg0, %arg1, %c0_i32 : i32, i32, i32
  }
  func.func @transform_1(%arg0: i32, %arg1: i32) -> (i32, i32, i32) {
    %c0_i32 = arith.constant 0 : i32
    %c0_i32_0 = arith.constant 0 : i32
    %c0_i32_1 = arith.constant 0 : i32
    return %arg0, %c0_i32, %c0_i32_0 : i32, i32, i32
  }
  func.func @transform_2(%arg0: i32, %arg1: i32) -> (i32, i32, i32) {
    %c0_i32 = arith.constant 0 : i32
    %c0_i32_0 = arith.constant 0 : i32
    return %arg0, %arg1, %c0_i32 : i32, i32, i32
  }
}

</mosaic_0001>

<bundles_post_ra>
// kernel: tpu_custom_call.1
= control target key start
LH: loop header
LB: loop body
LE: loop exit
PB: predicated region body
PF: predicated region fallthrough
CT: control target
= control target key end

     0   :  { %7 = vsyncpa [#allocation3], 0  ;;  %s181_s0 = inlined_call_operand.hbm [shape: f32[2,8,128], index: 0, kind: input, shape index: {}]   ;;  %s182_s1 = inlined_call_operand.vmem [shape: f32[2,1,1], index: 1, kind: input, shape index: {}]   ;;  %s183_s2 = inlined_call_operand.hbm [shape: f32[2,8,128], index: 2, kind: output, shape index: {}]  }
   0x1   :  { %8 = vsyncpa [#allocation4], 0  ;;  %s125_s9 = smov [#allocation2]   ;;  %s77_s13 = scalar_lea.hbm %s181_s0, 256 }
   0x2   :  { %s14_s10 = sshll.u32 %s125_s9, 4  ;;  %p78_p0 = scmp.ne.s32.totalorder %s181_s0, %s77_s13  ;;  %s15_s10 = int_to_ptr.vmem [resolvable:$true] %s14_s10 }
   0x3   :  { %p81_p1 = scmp.lt.u32.totalorder %s77_s13, %s181_s0 }
   0x5   :  { %p83_p2 = pnand %p81_p1, %p78_p0 }
   0x7   :  { %86 = shalt.err (!%p83_p2)
}
   0x8   :  { %s87_s18 = scalar_lea.vmem %s15_s10, 256  ;;  %p92_p4 = scmp.lt.s32.totalorder %s15_s10, %s15_s10 }
   0x9   :  { %p88_p3 = scmp.ne.s32.totalorder %s15_s10, %s87_s18  ;;  %p93_p5 = scmp.lt.s32.totalorder %s87_s18, %s87_s18 }
   0xb   :  { %p94_p6 = por %p93_p5, %p92_p4 }
   0xd   :  { %p95_p7 = pnand %p94_p6, %p88_p3 }
   0xf   :  { %98 = shalt.err (!%p95_p7)
}
  0x10   :  { %s126_s19 = smov 128   ;;  %s127_s20 = smov 8  }
  0x11   :  { %20 = dma.hbm_to_vmem [thread:$0]  %s181_s0, 256, %s15_s10, [#allocation3], %s126_s19, %s126_s19, %s127_s20  }
  0x12   :  { %121 = dma.done.wait [#allocation3], 256  }
  0x13   :  { %122 = vsyncadd [#allocation3], 4294967040  ;;  %v128_v0 = vmov 0   ;;  %v69_v1 = vld [vmem:[%s182_s1] ss:$0 sm:$0xff]  ;;  %v27_v6 = vld [vmem:[#allocation2 + $0x8] sm:$0xff] }
  0x14   :  { %76 = vset.pattern.permute.xlu0 %v128_v0  ;;  %v70_v2 = vld [vmem:[%s182_s1 + $0x1] ss:$0 sm:$0xff]  ;;  %s129_s27 = smov [#allocation5]  }
  0x15   :  { %41 = vperm.xlu0 %76, %v69_v1   ;;  %v26_v3 = vld [vmem:[#allocation2] sm:$0xff]  ;;  %s57_s0 = sshll.u32 %s129_s27, 4  ;;  %s58_s0 = int_to_ptr.vmem [resolvable:$true] %s57_s0 }
  0x16   :  { %s99_s28 = scalar_lea.vmem %s58_s0, 256  ;;  %p104_p9 = scmp.lt.s32.totalorder %s58_s0, %s58_s0 }
  0x17   :  { %p100_p8 = scmp.ne.s32.totalorder %s58_s0, %s99_s28  ;;  %p105_p10 = scmp.lt.s32.totalorder %s99_s28, %s99_s28 }
  0x19   :  { %45 = vperm.xlu0 %76, %v70_v2   ;;  %p106_p11 = por %p105_p10, %p104_p9 }
  0x1b   :  { %p107_p12 = pnand %p106_p11, %p100_p8 }
  0x94   :  { %v42_v4 = vpop.permute.xlu0 %41 }
  0x95   :  { %v48_v5 = vmul.f32 %v42_v4, %v26_v3 }
  0x97   :  { %50 = vst [vmem:[#allocation5] sm:$0xff] %v48_v5 }
  0x98   :  { %v46_v7 = vpop.permute.xlu0 %45 }
  0x99   :  { %v49_v8 = vmul.f32 %v46_v7, %v27_v6 }
  0x9b   :  { %51 = vst [vmem:[#allocation5 + $0x8] sm:$0xff] %v49_v8 }
  0x9c   :  { %110 = shalt.err (!%p107_p12)
}
  0x9d   :  { %s111_s30 = scalar_lea.hbm %s183_s2, 256 }
  0x9e   :  { %p112_p13 = scmp.ne.s32.totalorder %s183_s2, %s111_s30  ;;  %p115_p0 = scmp.lt.u32.totalorder %s111_s30, %s183_s2 }
  0xa0   :  { %p117_p1 = pnand %p115_p0, %p112_p13 }
  0xa2   :  { %120 = shalt.err (!%p117_p1)
}
  0xa3   :  { %63 = dma.vmem_to_hbm [thread:$0]  %s58_s0, 256, %s183_s2, [#allocation4], %s126_s19, %s126_s19, %s127_s20  }
  0xa4   :  { %123 = dma.done.wait [#allocation4], 256  }
  0xa5   :  { %124 = vsyncadd [#allocation4], 4294967040 }
  0xa6   :  { %67 = vsyncpa [#allocation3], 1 }
  0xa7   :  { %68 = vsyncpa [#allocation4], 1 }

</bundles_post_ra>
